<compile_context>
chip_gen: v7x
topology: tpu7x:2x2x1
jax: 0.10.0
libtpu: 0.0.40
codegen_flags: <defaults>
</compile_context>

<pallas_src>
import functools

import jax
import jax.numpy as jnp
from jax import lax
from jax.experimental import pallas as pl
from jax.experimental.pallas import tpu as pltpu


# ----------------------------------------------------------------------------
# Static (trace-time) helpers for the phase decomposition.
# ----------------------------------------------------------------------------
def _window_params(k, s, p, n_in, n_coarse):
    """Window geometry for one spatial axis of the phase-decomposed deconv.

    For output index o = a + s*j (a = o % s), the contributing input indices are
    j + d with d = (a+p)//s - t for taps t >= 0 such that (a+p)%s + s*t < k.
    Returns (d_lo, win, base, pad_lo, pad_hi).
    """
    ds = []
    for a in range(s):
        ph = (a + p) % s
        m0 = (a + p) // s
        t = 0
        while ph + s * t < k:
            ds.append(m0 - t)
            t += 1
    if not ds:
        ds = [0]
    d_lo, d_hi = min(ds), max(ds)
    win = d_hi - d_lo + 1
    pad_lo = max(0, -d_lo)
    base = d_lo + pad_lo
    pad_hi = max(0, (n_coarse - 1) + base + (win - 1) - (n_in + pad_lo - 1))
    return d_lo, win, base, pad_lo, pad_hi


def _phase_weights(weight, s, p, k_h, k_w, win_h, win_w, d_lo_h, d_lo_w):
    """(win_h, win_w, C_in, s, s, C_out) per-phase tap tensor (flip absorbed)."""
    c_in, c_out = weight.shape[0], weight.shape[1]
    wu = jnp.zeros((win_h, win_w, c_in, s, s, c_out), weight.dtype)
    for a in range(s):
        ph_h = (a + p) % s
        m0_h = (a + p) // s
        t_h = 0
        while ph_h + s * t_h < k_h:
            u_h = m0_h - t_h - d_lo_h
            kh = ph_h + s * t_h
            for b in range(s):
                ph_w = (b + p) % s
                m0_w = (b + p) // s
                t_w = 0
                while ph_w + s * t_w < k_w:
                    u_w = m0_w - t_w - d_lo_w
                    kw = ph_w + s * t_w
                    wu = wu.at[u_h, u_w, :, a, b, :].set(weight[:, :, kh, kw])
                    t_w += 1
            t_h += 1
    return wu


def _toeplitz_weights(weight, s, p, k_h, k_w, win_h, win_w, d_lo_h, d_lo_w,
                      w_in, wq):
    """Per-uh block-Toeplitz weight, shape (win_h, W*C_in, s*Wq*s*C_out).

    Output-column order is (a, c, b, co): the matmul result is already the
    phase-un-interleaved output (rows split by `a` via a row-major reshape,
    lanes = (ow = c*s+b, co) interleaved).  Width zero-padding and the spatial
    flip are absorbed: input columns iw outside [0, W) simply do not exist.
    """
    c_in, c_out = weight.shape[0], weight.shape[1]
    wph = _phase_weights(weight, s, p, k_h, k_w, win_h, win_w, d_lo_h, d_lo_w)
    # Selector S[iw, c, uw] = 1  iff  iw == c + uw + d_lo_w.
    iw = jnp.arange(w_in)[:, None, None]
    c = jnp.arange(wq)[None, :, None]
    uw = jnp.arange(win_w)[None, None, :]
    sel = (iw == c + uw + d_lo_w).astype(weight.dtype)
    wbig = jnp.einsum('wcu,huiabo->hwiacbo', sel, wph)
    return wbig.reshape(win_h, w_in * c_in, s * wq * s * c_out)


def _pick_row_block(hq, requested=None):
    """Coarse-output-row strip size: multiple of 8 (sublane aligned) or full."""
    if requested is not None:
        if hq % requested != 0 or not (requested % 8 == 0 or requested == hq):
            raise ValueError("row_block must divide Hq and be a multiple of 8 "
                             "(or equal Hq)")
        return requested
    best = hq
    for cand in range(8, min(hq, 512) + 1, 8):
        if hq % cand == 0:
            best = cand
    return best


def _pick_batch_block(n, per_image_coarse_px, per_image_bytes, requested=None):
    """Fold several batch images into one grid step while blocks stay small."""
    if requested is not None:
        if n % requested != 0:
            raise ValueError("batch_block must divide the batch size")
        return requested
    nb = 1
    for cand in range(1, n + 1):
        if n % cand:
            continue
        if (cand * per_image_coarse_px <= 4096
                and cand * per_image_bytes <= (4 << 20)):
            nb = cand
    return nb


# ----------------------------------------------------------------------------
# Kernel: nb batch images x one coarse-row strip per grid step.
# ----------------------------------------------------------------------------
def _deconv_rows_kernel(x_ref, w_ref, b_ref, o_ref, *, nb, t_rows, win_h,
                        base_h, apply_relu):
    # x_ref: (nb, H_pad, W*C_in)   row-halo-padded, channel-interleaved rows
    # w_ref: (win_h, W*C_in, L)    block-Toeplitz phase weight, L = s*Wq*s*C_out
    # b_ref: (1, L)                f32 bias pre-broadcast to the L layout
    # o_ref: (nb, t_rows, L)       lane-dense, phase-un-interleaved output rows
    row0 = pl.multiple_of(pl.program_id(1) * t_rows, t_rows) + base_h
    bias = b_ref[...]
    for i in range(nb):                      # static, small
        acc = jnp.dot(x_ref[i, pl.ds(row0, t_rows), :], w_ref[0],
                      preferred_element_type=jnp.float32)
        for uh in range(1, win_h):           # static, ceil(kH/stride) - 1 iters
            acc += jnp.dot(x_ref[i, pl.ds(row0 + uh, t_rows), :], w_ref[uh],
                           preferred_element_type=jnp.float32)
        acc += bias
        if apply_relu:
            acc = jnp.maximum(acc, 0.0)
        o_ref[i, :, :] = acc.astype(o_ref.dtype)


# ----------------------------------------------------------------------------
# Wrapper: ConvTranspose2d(stride, padding, output_padding) + optional ReLU.
# ----------------------------------------------------------------------------
def deconv_forward(x_nchw, weight, bias, *, stride=2, padding=0,
                   output_padding=0, act=False, row_block=None,
                   batch_block=None, use_bf16=False):
    """x: (N,C_in,H,W), weight: (C_in,C_out,kH,kW), bias: (C_out,) -> NCHW."""
    N, C_in, H, W = x_nchw.shape
    wc_in, C_out, kH, kW = weight.shape
    assert wc_in == C_in
    s, p, op = stride, padding, output_padding

    H_out = (H - 1) * s - 2 * p + kH + op
    W_out = (W - 1) * s - 2 * p + kW + op
    Hq = -(-H_out // s)        # coarse (per-phase) output rows
    Wq = -(-W_out // s)        # coarse (per-phase) output cols

    d_lo_h, win_h, base_h, pl_h, ph_h = _window_params(kH, s, p, H, Hq)
    d_lo_w, win_w, _, _, _ = _window_params(kW, s, p, W, Wq)

    K = W * C_in                 # lane-dense input row width
    L = s * Wq * s * C_out       # lane-dense output row width

    # Glue: NCHW -> (N, H, W*C_in) lane-dense rows + tiny row-halo zero pad.
    # (Width halo/padding lives inside the Toeplitz weight; no dilated input.)
    x_rows = jnp.transpose(x_nchw, (0, 2, 3, 1)).reshape(N, H, K)
    x_rows = jnp.pad(x_rows, ((0, 0), (pl_h, ph_h), (0, 0)))
    H_pad = H + pl_h + ph_h

    # Halo sanity (VMEM reads are not bounds-checked at runtime).
    assert base_h >= 0, "row-halo bookkeeping bug (negative base)"
    assert (Hq - 1) + base_h + (win_h - 1) <= H_pad - 1, \
        "row-halo bookkeeping bug (read past padded rows)"

    w_big = _toeplitz_weights(weight, s, p, kH, kW, win_h, win_w,
                              d_lo_h, d_lo_w, W, Wq)
    b_big = jnp.broadcast_to(bias.astype(jnp.float32),
                             (s, Wq, s, C_out)).reshape(1, L)

    if use_bf16:  # hoisted casts: operands arrive bf16, accumulation stays f32
        x_rows = x_rows.astype(jnp.bfloat16)
        w_big = w_big.astype(jnp.bfloat16)

    t_rows = _pick_row_block(Hq, row_block)
    n_strips = Hq // t_rows
    itemsize = x_rows.dtype.itemsize
    nb = _pick_batch_block(N, t_rows * Wq, H_pad * K * itemsize, batch_block)
    n_bblocks = N // nb

    kernel = functools.partial(
        _deconv_rows_kernel, nb=nb, t_rows=t_rows, win_h=win_h, base_h=base_h,
        apply_relu=act)

    # VMEM budget (double-buffered input/output, resident weight, f32 temps).
    est_vmem = (2 * nb * H_pad * K * itemsize
                + 2 * win_h * K * L * itemsize
                + 2 * nb * t_rows * L * x_nchw.dtype.itemsize
                + 4 * t_rows * L * 4 + (1 << 20))
    vmem_limit = int(min(64 << 20, max(16 << 20, 2 * est_vmem)))

    cost = pl.CostEstimate(
        flops=int(2 * N * Hq * win_h * K * L),
        transcendentals=0,
        bytes_accessed=int(x_rows.size * itemsize + w_big.size * itemsize
                           + N * Hq * L * x_nchw.dtype.itemsize))

    y = pl.pallas_call(
        kernel,
        out_shape=jax.ShapeDtypeStruct((N, Hq, L), x_nchw.dtype),
        grid_spec=pltpu.PrefetchScalarGridSpec(
            num_scalar_prefetch=0,
            grid=(n_bblocks, n_strips),
            in_specs=[
                # nb padded images (reused across row strips of those images)
                pl.BlockSpec((nb, H_pad, K), lambda bi, ri: (bi, 0, 0)),
                # Toeplitz phase weight / bias: resident across the whole grid
                pl.BlockSpec((win_h, K, L), lambda bi, ri: (0, 0, 0)),
                pl.BlockSpec((1, L), lambda bi, ri: (0, 0)),
            ],
            out_specs=pl.BlockSpec((nb, t_rows, L), lambda bi, ri: (bi, ri, 0)),
        ),
        compiler_params=pltpu.CompilerParams(
            dimension_semantics=("parallel", "arbitrary"),
            vmem_limit_bytes=vmem_limit),
        cost_estimate=cost,
    )(x_rows, w_big, b_big)

    # (N, Hq, L) -> (N, Hq*s, Wq*s, C_out) is a pure row-major reinterpretation
    # (free): phases were un-interleaved by the weight's column ordering.
    y = y.reshape(N, Hq * s, Wq * s, C_out)
    y = y[:, :H_out, :W_out, :]
    return jnp.transpose(y, (0, 3, 1, 2))


# ----------------------------------------------------------------------------
# Pure-JAX reference (matches PyTorch ConvTranspose2d exactly).
# ----------------------------------------------------------------------------
def _reference(x_nchw, weight, bias, *, stride, padding, output_padding, act):
    C_in, C_out, kH, kW = weight.shape
    rhs = jnp.transpose(weight[:, :, ::-1, ::-1], (1, 0, 2, 3))  # OIHW
    out = lax.conv_general_dilated(
        x_nchw, rhs,
        window_strides=(1, 1),
        padding=[(kH - 1 - padding, kH - 1 - padding + output_padding),
                 (kW - 1 - padding, kW - 1 - padding + output_padding)],
        lhs_dilation=(stride, stride),
        dimension_numbers=("NCHW", "OIHW", "NCHW"),
    ) + bias.reshape(1, C_out, 1, 1)
    if act:
        out = jnp.maximum(out, 0.0)
    return out


if __name__ == "__main__":
    # Deconv(input_channels=4, n_feats=8, kernel_size=3,
    #        stride=2, padding=1, output_padding=1, bias=True, act=True)
    input_channels, n_feats, kernel_size = 4, 8, 3
    stride, padding, output_padding = 2, 1, 1

    key = jax.random.PRNGKey(0)
    kx, kw_key, kb = jax.random.split(key, 3)

    N, H, W = 2, 16, 16
    x = jax.random.normal(kx, (N, input_channels, H, W), dtype=jnp.float32)
    weight = 0.1 * jax.random.normal(
        kw_key, (input_channels, n_feats, kernel_size, kernel_size),
        dtype=jnp.float32)
    bias = 0.05 * jax.random.normal(kb, (n_feats,), dtype=jnp.float32)

    # act=True path (fused ReLU); batch + full-Hq strip folded into one step.
    out = deconv_forward(x, weight, bias, stride=stride, padding=padding,
                         output_padding=output_padding, act=True)
    out = jax.block_until_ready(out)
    ref = _reference(x, weight, bias, stride=stride, padding=padding,
                     output_padding=output_padding, act=True)
    assert out.shape == (N, n_feats, 2 * H, 2 * W)
    err = float(jnp.max(jnp.abs(out - ref)))
    assert err < 1e-4, f"mismatch vs reference (act=True): {err}"

    # act=False path (bias-only epilogue).
    out2 = jax.block_until_ready(
        deconv_forward(x, weight, bias, stride=stride, padding=padding,
                       output_padding=output_padding, act=False))
    ref2 = _reference(x, weight, bias, stride=stride, padding=padding,
                      output_padding=output_padding, act=False)
    err2 = float(jnp.max(jnp.abs(out2 - ref2)))
    assert err2 < 1e-4, f"mismatch vs reference (act=False): {err2}"

    # bf16 fast path (casts hoisted to the wrapper, f32 accumulation): loose tol.
    out3 = jax.block_until_ready(
        deconv_forward(x, weight, bias, stride=stride, padding=padding,
                       output_padding=output_padding, act=True, use_bf16=True))
    err3 = float(jnp.max(jnp.abs(out3 - ref)))
    assert err3 < 1e-1, f"bf16 path mismatch too large: {err3}"

    print("KERNEL_OK")
</pallas_src>

<mosaic_0001>
module attributes {stable_mosaic.version = 11 : i64} {
  func.func @_deconv_rows_kernel(%arg0: i32, %arg1: i32, %arg2: memref<2x17x64xf32, #tpu.memory_space<vmem>>, %arg3: memref<2x64x512xf32, #tpu.memory_space<vmem>>, %arg4: memref<1x512xf32, #tpu.memory_space<vmem>>, %arg5: memref<2x16x512xf32, #tpu.memory_space<vmem>>) attributes {dimension_semantics = [#tpu.dimension_semantics<parallel>, #tpu.dimension_semantics<arbitrary>], iteration_bounds = array<i64: 1, 1>, scalar_prefetch = 0 : i64, scratch_operands = 0 : i64, tpu.core_type = #tpu.core_type<tc>, window_params = [{transform_indices = @transform_0, window_bounds = array<i64: 2, 17, 64>}, {pipeline_mode = #tpu.pipeline_mode<synchronous>, transform_indices = @transform_1, window_bounds = array<i64: 2, 64, 512>}, {pipeline_mode = #tpu.pipeline_mode<synchronous>, transform_indices = @transform_2, window_bounds = array<i64: 1, 512>}, {transform_indices = @transform_3, window_bounds = array<i64: 2, 16, 512>}]} {
    %c16_i32 = arith.constant 16 : i32
    %0 = arith.muli %arg1, %c16_i32 : i32
    %1 = tpu.assume_multiple %0, 16 : i32
    %c0_i32 = arith.constant 0 : i32
    %2 = arith.addi %1, %c0_i32 : i32
    %c0 = arith.constant 0 : index
    %c0_0 = arith.constant 0 : index
    %3 = vector.load %arg4[%c0, %c0_0] : memref<1x512xf32, #tpu.memory_space<vmem>>, vector<1x512xf32>
    %c0_1 = arith.constant 0 : index
    %4 = arith.index_cast %2 : i32 to index
    %c0_2 = arith.constant 0 : index
    %5 = vector.load %arg2[%c0_1, %4, %c0_2] : memref<2x17x64xf32, #tpu.memory_space<vmem>>, vector<1x16x64xf32>
    %6 = vector.shape_cast %5 : vector<1x16x64xf32> to vector<16x64xf32>
    %c0_3 = arith.constant 0 : index
    %c0_4 = arith.constant 0 : index
    %c0_5 = arith.constant 0 : index
    %7 = vector.load %arg3[%c0_3, %c0_4, %c0_5] : memref<2x64x512xf32, #tpu.memory_space<vmem>>, vector<1x64x512xf32>
    %8 = vector.shape_cast %7 : vector<1x64x512xf32> to vector<64x512xf32>
    %cst = arith.constant dense<0.000000e+00> : vector<16x512xf32>
    %9 = tpu.matmul %6, %8, %cst {dimension_numbers = #tpu.dot_dimension_numbers<[1], [0], [0], [1], [0, 0, 1, 1], [], []>} : vector<16x64xf32>, vector<64x512xf32>, vector<16x512xf32> -> vector<16x512xf32>
    %c1_i32 = arith.constant 1 : i32
    %10 = arith.addi %2, %c1_i32 : i32
    %c0_6 = arith.constant 0 : index
    %11 = arith.index_cast %10 : i32 to index
    %c0_7 = arith.constant 0 : index
    %12 = vector.load %arg2[%c0_6, %11, %c0_7] : memref<2x17x64xf32, #tpu.memory_space<vmem>>, vector<1x16x64xf32>
    %13 = vector.shape_cast %12 : vector<1x16x64xf32> to vector<16x64xf32>
    %c1 = arith.constant 1 : index
    %c0_8 = arith.constant 0 : index
    %c0_9 = arith.constant 0 : index
    %14 = vector.load %arg3[%c1, %c0_8, %c0_9] : memref<2x64x512xf32, #tpu.memory_space<vmem>>, vector<1x64x512xf32>
    %15 = vector.shape_cast %14 : vector<1x64x512xf32> to vector<64x512xf32>
    %cst_10 = arith.constant dense<0.000000e+00> : vector<16x512xf32>
    %16 = tpu.matmul %13, %15, %cst_10 {dimension_numbers = #tpu.dot_dimension_numbers<[1], [0], [0], [1], [0, 0, 1, 1], [], []>} : vector<16x64xf32>, vector<64x512xf32>, vector<16x512xf32> -> vector<16x512xf32>
    %17 = arith.addf %9, %16 : vector<16x512xf32>
    %18 = vector.broadcast %3 : vector<1x512xf32> to vector<16x512xf32>
    %19 = arith.addf %17, %18 : vector<16x512xf32>
    %cst_11 = arith.constant 0.000000e+00 : f32
    %20 = vector.broadcast %cst_11 : f32 to vector<16x512xf32>
    %21 = arith.maximumf %19, %20 : vector<16x512xf32>
    %c0_12 = arith.constant 0 : index
    %c0_13 = arith.constant 0 : index
    %c0_14 = arith.constant 0 : index
    %22 = vector.load %arg5[%c0_12, %c0_13, %c0_14] : memref<2x16x512xf32, #tpu.memory_space<vmem>>, vector<1x16x512xf32>
    %23 = vector.shape_cast %22 : vector<1x16x512xf32> to vector<16x512xf32>
    %24 = vector.shape_cast %21 : vector<16x512xf32> to vector<1x16x512xf32>
    tpu.vector_store %arg5[%c0_12, %c0_13, %c0_14], %24 {strides = array<i32>} : memref<2x16x512xf32, #tpu.memory_space<vmem>>, vector<1x16x512xf32>,
    %c1_15 = arith.constant 1 : index
    %25 = arith.index_cast %2 : i32 to index
    %c0_16 = arith.constant 0 : index
    %26 = vector.load %arg2[%c1_15, %25, %c0_16] : memref<2x17x64xf32, #tpu.memory_space<vmem>>, vector<1x16x64xf32>
    %27 = vector.shape_cast %26 : vector<1x16x64xf32> to vector<16x64xf32>
    %c0_17 = arith.constant 0 : index
    %c0_18 = arith.constant 0 : index
    %c0_19 = arith.constant 0 : index
    %28 = vector.load %arg3[%c0_17, %c0_18, %c0_19] : memref<2x64x512xf32, #tpu.memory_space<vmem>>, vector<1x64x512xf32>
    %29 = vector.shape_cast %28 : vector<1x64x512xf32> to vector<64x512xf32>
    %cst_20 = arith.constant dense<0.000000e+00> : vector<16x512xf32>
    %30 = tpu.matmul %27, %29, %cst_20 {dimension_numbers = #tpu.dot_dimension_numbers<[1], [0], [0], [1], [0, 0, 1, 1], [], []>} : vector<16x64xf32>, vector<64x512xf32>, vector<16x512xf32> -> vector<16x512xf32>
    %c1_i32_21 = arith.constant 1 : i32
    %31 = arith.addi %2, %c1_i32_21 : i32
    %c1_22 = arith.constant 1 : index
    %32 = arith.index_cast %31 : i32 to index
    %c0_23 = arith.constant 0 : index
    %33 = vector.load %arg2[%c1_22, %32, %c0_23] : memref<2x17x64xf32, #tpu.memory_space<vmem>>, vector<1x16x64xf32>
    %34 = vector.shape_cast %33 : vector<1x16x64xf32> to vector<16x64xf32>
    %c1_24 = arith.constant 1 : index
    %c0_25 = arith.constant 0 : index
    %c0_26 = arith.constant 0 : index
    %35 = vector.load %arg3[%c1_24, %c0_25, %c0_26] : memref<2x64x512xf32, #tpu.memory_space<vmem>>, vector<1x64x512xf32>
    %36 = vector.shape_cast %35 : vector<1x64x512xf32> to vector<64x512xf32>
    %cst_27 = arith.constant dense<0.000000e+00> : vector<16x512xf32>
    %37 = tpu.matmul %34, %36, %cst_27 {dimension_numbers = #tpu.dot_dimension_numbers<[1], [0], [0], [1], [0, 0, 1, 1], [], []>} : vector<16x64xf32>, vector<64x512xf32>, vector<16x512xf32> -> vector<16x512xf32>
    %38 = arith.addf %30, %37 : vector<16x512xf32>
    %39 = vector.broadcast %3 : vector<1x512xf32> to vector<16x512xf32>
    %40 = arith.addf %38, %39 : vector<16x512xf32>
    %cst_28 = arith.constant 0.000000e+00 : f32
    %41 = vector.broadcast %cst_28 : f32 to vector<16x512xf32>
    %42 = arith.maximumf %40, %41 : vector<16x512xf32>
    %c1_29 = arith.constant 1 : index
    %c0_30 = arith.constant 0 : index
    %c0_31 = arith.constant 0 : index
    %43 = vector.load %arg5[%c1_29, %c0_30, %c0_31] : memref<2x16x512xf32, #tpu.memory_space<vmem>>, vector<1x16x512xf32>
    %44 = vector.shape_cast %43 : vector<1x16x512xf32> to vector<16x512xf32>
    %45 = vector.shape_cast %42 : vector<16x512xf32> to vector<1x16x512xf32>
    tpu.vector_store %arg5[%c1_29, %c0_30, %c0_31], %45 {strides = array<i32>} : memref<2x16x512xf32, #tpu.memory_space<vmem>>, vector<1x16x512xf32>,
    return
  }
  func.func @transform_0(%arg0: i32, %arg1: i32) -> (i32, i32, i32) {
    %c0_i32 = arith.constant 0 : i32
    %c0_i32_0 = arith.constant 0 : i32
    %c0_i32_1 = arith.constant 0 : i32
    return %arg0, %c0_i32, %c0_i32_0 : i32, i32, i32
  }
  func.func @transform_1(%arg0: i32, %arg1: i32) -> (i32, i32, i32) {
    %c0_i32 = arith.constant 0 : i32
    %c0_i32_0 = arith.constant 0 : i32
    %c0_i32_1 = arith.constant 0 : i32
    %c0_i32_2 = arith.constant 0 : i32
    return %c0_i32, %c0_i32_0, %c0_i32_1 : i32, i32, i32
  }
  func.func @transform_2(%arg0: i32, %arg1: i32) -> (i32, i32) {
    %c0_i32 = arith.constant 0 : i32
    %c0_i32_0 = arith.constant 0 : i32
    %c0_i32_1 = arith.constant 0 : i32
    return %c0_i32, %c0_i32_0 : i32, i32
  }
  func.func @transform_3(%arg0: i32, %arg1: i32) -> (i32, i32, i32) {
    %c0_i32 = arith.constant 0 : i32
    %c0_i32_0 = arith.constant 0 : i32
    return %arg0, %arg1, %c0_i32 : i32, i32, i32
  }
}

</mosaic_0001>

<bundles_post_ra>
// kernel: tpu_custom_call.1
= control target key start
LH: loop header
LB: loop body
LE: loop exit
PB: predicated region body
PF: predicated region fallthrough
CT: control target
= control target key end

     0   :  { %8 = vsyncpa [#allocation3], 0  ;;  %s1355_s0 = inlined_call_operand.vmem [shape: f32[2,17,64], index: 0, kind: input, shape index: {}]   ;;  %s1356_s1 = inlined_call_operand.hbm [shape: f32[2,64,512], index: 1, kind: input, shape index: {}]   ;;  %s1357_s2 = inlined_call_operand.vmem [shape: f32[1,512], index: 2, kind: input, shape index: {}]   ;;  %s1358_s3 = inlined_call_operand.hbm [shape: f32[2,16,512], index: 3, kind: output, shape index: {}]  }
   0x1   :  { %9 = vsyncpa [#allocation4], 0  ;;  %s1125_s12 = smov [#allocation2]   ;;  %s1077_s16 = scalar_lea.hbm %s1356_s1, 8192 }
   0x2   :  { %s17_s13 = sshll.u32 %s1125_s12, 4  ;;  %p1078_p0 = scmp.ne.s32.totalorder %s1356_s1, %s1077_s16  ;;  %s18_s13 = int_to_ptr.vmem [resolvable:$true] %s17_s13 }
   0x3   :  { %p1081_p1 = scmp.lt.u32.totalorder %s1077_s16, %s1356_s1 }
   0x5   :  { %p1083_p2 = pnand %p1081_p1, %p1078_p0 }
   0x7   :  { %1086 = shalt.err (!%p1083_p2)
}
   0x8   :  { %s1087_s21 = scalar_lea.vmem %s18_s13, 8192  ;;  %p1092_p4 = scmp.lt.s32.totalorder %s18_s13, %s18_s13 }
   0x9   :  { %p1088_p3 = scmp.ne.s32.totalorder %s18_s13, %s1087_s21  ;;  %p1093_p5 = scmp.lt.s32.totalorder %s1087_s21, %s1087_s21 }
   0xb   :  { %p1094_p6 = por %p1093_p5, %p1092_p4 }
   0xd   :  { %p1095_p7 = pnand %p1094_p6, %p1088_p3 }
   0xf   :  { %1098 = shalt.err (!%p1095_p7)
}
  0x10   :  { %s1126_s22 = smov 512   ;;  %s1127_s23 = smov 32  }
  0x11   :  { %23 = dma.hbm_to_vmem [thread:$0]  %s1356_s1, 8192, %s18_s13, [#allocation3], %s1126_s22, %s1126_s22, %s1127_s23  }
  0x12   :  { %1121 = dma.done.wait [#allocation3], 8192  }
  0x13   :  { %1122 = vsyncadd [#allocation3], 4294959104  ;;  %v1128_v0 = vmov 0.0   ;;  %v72_v1 = vld [vmem:[#allocation2 + $0x108] sm:$0xff]  ;;  %v74_v3 = vld [vmem:[#allocation2 + $0x118] sm:$0xff]  ;;  %vm103_vm0 = vcmask 523264  }
  0x14   :  { %174 = vmatprep.mubr.f32.mxu0 %v1128_v0  ;;  %251 = vmatprep.mubr.f32.mxu1 %v1128_v0  ;;  %v76_v2 = vld [vmem:[#allocation2 + $0x128] sm:$0xff]  ;;  %v78_v5 = vld [vmem:[#allocation2 + $0x138] sm:$0xff]  ;;  %v71_v6 = vld [vmem:[#allocation2 + $0x100] sm:$0xff] }
  0x15   :  { %v1167_v4 = vpack.c.bf16 %v76_v2, %v72_v1  ;;  %v75_v7 = vld [vmem:[#allocation2 + $0x120] sm:$0xff]  ;;  %v1169_v8 = vpack.c.bf16 %v78_v5, %v74_v3  ;;  %v73_v10 = vld [vmem:[#allocation2 + $0x110] sm:$0xff]  ;;  %v80_v12 = vld [vmem:[#allocation2 + $0x148] sm:$0xff] }
  0x16   :  { %v1171_v9 = vpack.c.bf16 %v75_v7, %v71_v6  ;;  %v77_v11 = vld [vmem:[#allocation2 + $0x130] sm:$0xff]  ;;  %v84_v14 = vld [vmem:[#allocation2 + $0x168] sm:$0xff]  ;;  %v82_v15 = vld [vmem:[#allocation2 + $0x158] sm:$0xff] }
  0x17   :  { %929 = vmatprep.subr.bf16.mxu0 %v1167_v4  ;;  %v1174_v13 = vpack.c.bf16 %v77_v11, %v73_v10  ;;  %v86_v16 = vld [vmem:[#allocation2 + $0x178] sm:$0xff]  ;;  %945 = vmatprep.subr.bf16.mxu1 %v1169_v8  ;;  %v1178_v17 = vpack.c.bf16 %v84_v14, %v80_v12  ;;  %v79_v19 = vld [vmem:[#allocation2 + $0x140] sm:$0xff]  ;;  %v81_v21 = vld [vmem:[#allocation2 + $0x150] sm:$0xff] }
  0x18   :  { %931 = vmatpush1.bf16.msra.mxu0 %v1171_v9  ;;  %v1180_v18 = vpack.c.bf16 %v86_v16, %v82_v15  ;;  %v83_v20 = vld [vmem:[#allocation2 + $0x160] sm:$0xff]  ;;  %v85_v23 = vld [vmem:[#allocation2 + $0x170] sm:$0xff]  ;;  %v88_v24 = vld [vmem:[#allocation2 + $0x188] sm:$0xff] }
  0x19   :  { %947 = vmatpush1.bf16.msra.mxu1 %v1174_v13  ;;  %v1183_v22 = vpack.c.bf16 %v83_v20, %v79_v19  ;;  %v92_v25 = vld [vmem:[#allocation2 + $0x1a8] sm:$0xff]  ;;  %933 = vmatprep.subr.bf16.mxu0 %v1178_v17  ;;  %v1187_v26 = vpack.c.bf16 %v85_v23, %v81_v21  ;;  %v90_v28 = vld [vmem:[#allocation2 + $0x198] sm:$0xff]  ;;  %v87_v30 = vld [vmem:[#allocation2 + $0x180] sm:$0xff] }
  0x1a   :  { %949 = vmatprep.subr.bf16.mxu1 %v1180_v18  ;;  %v1189_v27 = vpack.c.bf16 %v92_v25, %v88_v24  ;;  %v94_v29 = vld [vmem:[#allocation2 + $0x1b8] sm:$0xff]  ;;  %v91_v32 = vld [vmem:[#allocation2 + $0x1a0] sm:$0xff]  ;;  %v89_v33 = vld [vmem:[#allocation2 + $0x190] sm:$0xff] }
  0x1b   :  { %v1191_v31 = vpack.c.bf16 %v94_v29, %v90_v28  ;;  %v93_v34 = vld [vmem:[#allocation2 + $0x1b0] sm:$0xff]  ;;  %v1194_v35 = vpack.c.bf16 %v91_v32, %v87_v30  ;;  %v96_v36 = vld [vmem:[#allocation2 + $0x1c8] sm:$0xff]  ;;  %v98_v38 = vld [vmem:[#allocation2 + $0x1d8] sm:$0xff] }
  0x1c   :  { %935 = vmatpush1.bf16.msra.mxu0 %v1183_v22  ;;  %v100_v37 = vld [vmem:[#allocation2 + $0x1e8] sm:$0xff]  ;;  %v1198_v39 = vpack.c.bf16 %v93_v34, %v89_v33  ;;  %v102_v41 = vld [vmem:[#allocation2 + $0x1f8] sm:$0xff]  ;;  %v95_v42 = vld [vmem:[#allocation2 + $0x1c0] sm:$0xff] }
  0x1d   :  { %951 = vmatpush1.bf16.msra.mxu1 %v1187_v26  ;;  %937 = vmatprep.subr.bf16.mxu0 %v1189_v27  ;;  %v1200_v40 = vpack.c.bf16 %v100_v37, %v96_v36  ;;  %v99_v43 = vld [vmem:[#allocation2 + $0x1e0] sm:$0xff]  ;;  %v1203_v44 = vpack.c.bf16 %v102_v41, %v98_v38  ;;  %v97_v45 = vld [vmem:[#allocation2 + $0x1d0] sm:$0xff]  ;;  %v35_v47 = vld [vmem:[#allocation2 + $0x8] sm:$0xff] }
  0x1e   :  { %953 = vmatprep.subr.bf16.mxu1 %v1191_v31  ;;  %v101_v46 = vld [vmem:[#allocation2 + $0x1f0] sm:$0xff]  ;;  %v39_v48 = vld [vmem:[#allocation2 + $0x28] sm:$0xff]  ;;  %v37_v49 = vld [vmem:[#allocation2 + $0x18] sm:$0xff]  ;;  %v1206_v51 = vpack.c.bf16 %v99_v43, %v95_v42 }
  0x1f   :  { %v41_v50 = vld [vmem:[#allocation2 + $0x38] sm:$0xff]  ;;  %v1210_v52 = vpack.c.bf16 %v101_v46, %v97_v45  ;;  %v1212_v53 = vpack.c.bf16 %v39_v48, %v35_v47  ;;  %v34_v54 = vld [vmem:[#allocation2] sm:$0xff]  ;;  %v36_v56 = vld [vmem:[#allocation2 + $0x10] sm:$0xff] }
  0x20   :  { %939 = vmatpush1.bf16.msra.mxu0 %v1194_v35  ;;  %v38_v55 = vld [vmem:[#allocation2 + $0x20] sm:$0xff]  ;;  %v1215_v57 = vpack.c.bf16 %v41_v50, %v37_v49  ;;  %v40_v58 = vld [vmem:[#allocation2 + $0x30] sm:$0xff]  ;;  %v43_v59 = vld [vmem:[#allocation2 + $0x48] sm:$0xff] }
  0x21   :  { %955 = vmatpush1.bf16.msra.mxu1 %v1198_v39  ;;  %941 = vmatprep.subr.bf16.mxu0 %v1200_v40  ;;  %v47_v60 = vld [vmem:[#allocation2 + $0x68] sm:$0xff]  ;;  %v45_v61 = vld [vmem:[#allocation2 + $0x58] sm:$0xff]  ;;  %v1221_v1 = vpack.c.bf16 %v38_v55, %v34_v54  ;;  %v1225_v2 = vpack.c.bf16 %v40_v58, %v36_v56  ;;  %v42_v5 = vld [vmem:[#allocation2 + $0x40] sm:$0xff] }
  0x22   :  { %957 = vmatprep.subr.bf16.mxu1 %v1203_v44  ;;  %v49_v62 = vld [vmem:[#allocation2 + $0x78] sm:$0xff]  ;;  %v1227_v3 = vpack.c.bf16 %v47_v60, %v43_v59  ;;  %v46_v6 = vld [vmem:[#allocation2 + $0x60] sm:$0xff]  ;;  %v44_v7 = vld [vmem:[#allocation2 + $0x50] sm:$0xff] }
  0x23   :  { %v906_v63 = vld [vmem:[%s1355_s0 + $0x1] sm:$0xff]  ;;  %v1230_v10 = vpack.c.bf16 %v49_v62, %v45_v61  ;;  %v51_v12 = vld [vmem:[#allocation2 + $0x88] sm:$0xff]  ;;  %v1235_v19 = vpack.c.bf16 %v46_v6, %v42_v5  ;;  %v907_v20 = vld [vmem:[%s1355_s0 + $0x9] sm:$0xff] }
  0x24   :  { %943 = vmatpush1.bf16.msra.mxu0 %v1206_v51  ;;  %v48_v11 = vld [vmem:[#allocation2 + $0x70] sm:$0xff]  ;;  %v55_v14 = vld [vmem:[#allocation2 + $0xa8] sm:$0xff]  ;;  %v53_v15 = vld [vmem:[#allocation2 + $0x98] sm:$0xff] }
  0x25   :  { %959 = vmatpush1.bf16.msra.mxu1 %v1210_v52  ;;  %961 = vmatprep.subr.bf16.mxu0 %v1212_v53  ;;  %v57_v16 = vld [vmem:[#allocation2 + $0xb8] sm:$0xff]  ;;  %v1242_v21 = vpack.c.bf16 %v48_v11, %v44_v7  ;;  %v1244_v23 = vpack.c.bf16 %v55_v14, %v51_v12  ;;  %v50_v24 = vld [vmem:[#allocation2 + $0x80] sm:$0xff]  ;;  %v52_v28 = vld [vmem:[#allocation2 + $0x90] sm:$0xff] }
  0x26   :  { %977 = vmatprep.subr.bf16.mxu1 %v1215_v57  ;;  %v54_v25 = vld [vmem:[#allocation2 + $0xa0] sm:$0xff]  ;;  %v1247_v29 = vpack.c.bf16 %v57_v16, %v53_v15  ;;  %v56_v30 = vld [vmem:[#allocation2 + $0xb0] sm:$0xff]  ;;  %v59_v32 = vld [vmem:[#allocation2 + $0xc8] sm:$0xff] }
  0x27   :  { %908 = vmatmul.mubr.msk.f32.vlgmr.msra.gmra.mrb[0].mxu0 %vm103_vm0, %v906_v63  ;;  %v63_v33 = vld [vmem:[#allocation2 + $0xe8] sm:$0xff]  ;;  %v61_v34 = vld [vmem:[#allocation2 + $0xd8] sm:$0xff]  ;;  %v1253_v37 = vpack.c.bf16 %v54_v25, %v50_v24  ;;  %v1258_v38 = vpack.c.bf16 %v56_v30, %v52_v28  ;;  %v58_v42 = vld [vmem:[#allocation2 + $0xc0] sm:$0xff] }
  0x28   :  { %910 = vmatmul.mubr.msk.f32.vlgmr.msra.gmra.mrb[0].mxu1 %vm103_vm0, %v906_v63  ;;  %963 = vmatpush1.bf16.msra.mxu0 %v1221_v1  ;;  %v65_v36 = vld [vmem:[#allocation2 + $0xf8] sm:$0xff]  ;;  %v1260_v41 = vpack.c.bf16 %v63_v33, %v59_v32  ;;  %v62_v43 = vld [vmem:[#allocation2 + $0xe0] sm:$0xff]  ;;  %v60_v46 = vld [vmem:[#allocation2 + $0xd0] sm:$0xff] }
  0x29   :  { %979 = vmatpush1.bf16.msra.mxu1 %v1225_v2  ;;  %965 = vmatprep.subr.bf16.mxu0 %v1227_v3  ;;  %v988_v45 = vpack.c.bf16 %v65_v36, %v61_v34  ;;  %v64_v47 = vld [vmem:[#allocation2 + $0xf0] sm:$0xff]  ;;  %v974_v48 = vpack.c.bf16 %v62_v43, %v58_v42  ;;  %v33_v54 = vld [vmem:[%s1355_s0 + $0x8] sm:$0xff] }
  0x2a   :  { %981 = vmatprep.subr.bf16.mxu1 %v1230_v10  ;;  %180 = vmatprep.mubr.f32.mxu0 %v1128_v0  ;;  %v990_v49 = vpack.c.bf16 %v64_v47, %v60_v46  ;;  %v32_v50 = vld [vmem:[%s1355_s0] sm:$0xff] }
  0x2b   :  { %257 = vmatprep.mubr.f32.mxu1 %v1128_v0  ;;  %909 = vmatmul.mubr.msk.f32.gmra.mrb[2].mxu0 %vm103_vm0, %v907_v20 }
  0x2c   :  { %967 = vmatpush1.bf16.msra.mxu0 %v1235_v19  ;;  %911 = vmatmul.mubr.msk.f32.gmra.mrb[2].mxu1 %vm103_vm0, %v907_v20 }
  0x2d   :  { %983 = vmatpush1.bf16.msra.mxu1 %v1242_v21  ;;  %969 = vmatprep.subr.bf16.mxu0 %v1244_v23 }
  0x2e   :  { %985 = vmatprep.subr.bf16.mxu1 %v1247_v29  ;;  %334 = vmatprep.mubr.f32.mxu0 %v1128_v0 }
  0x2f   :  { %411 = vmatprep.mubr.f32.mxu1 %v1128_v0 }
  0x30   :  { %971 = vmatpush1.bf16.msra.mxu0 %v1253_v37 }
  0x31   :  { %987 = vmatpush1.bf16.msra.mxu1 %v1258_v38  ;;  %973 = vmatprep.subr.bf16.mxu0 %v1260_v41 }
  0x32   :  { %989 = vmatprep.subr.bf16.mxu1 %v988_v45 }
  0x34   :  { %975 = vmatpush1.bf16.msra.mxu0 %v974_v48 }
  0x35   :  { %991 = vmatpush1.bf16.msra.mxu1 %v990_v49  ;;  %993 = vmatprep.subr.bf16.mxu0 %v1167_v4  ;;  %v918_v4 = vld [vmem:[%s1355_s0 + $0x19] sm:$0xff] }
  0x36   :  { %1009 = vmatprep.subr.bf16.mxu1 %v1169_v8  ;;  %v919_v8 = vld [vmem:[%s1355_s0 + $0x21] sm:$0xff] }
  0x37   :  { %912 = vmatmul.mubr.msk.f32.vlgmr.msra.gmra.mrb[0].mxu0 %vm103_vm0, %v32_v50 }
  0x38   :  { %914 = vmatmul.mubr.msk.f32.vlgmr.msra.gmra.mrb[0].mxu1 %vm103_vm0, %v32_v50  ;;  %995 = vmatpush1.bf16.msra.mxu0 %v1171_v9  ;;  %v916_v9 = vld [vmem:[%s1355_s0 + $0x18] sm:$0xff] }
  0x39   :  { %1011 = vmatpush1.bf16.msra.mxu1 %v1174_v13  ;;  %340 = vmatprep.mubr.f32.mxu0 %v1128_v0  ;;  %v917_v13 = vld [vmem:[%s1355_s0 + $0x20] sm:$0xff]  ;;  %s1129_s0 = smov [#allocation5]  }
  0x3a   :  { %417 = vmatprep.mubr.f32.mxu1 %v1128_v0  ;;  %997 = vmatprep.subr.bf16.mxu0 %v1178_v17  ;;  %v425_v17 = vlaneseq }
  0x3b   :  { %913 = vmatmul.mubr.msk.f32.gmra.mrb[2].mxu0 %vm103_vm0, %v33_v54  ;;  %1013 = vmatprep.subr.bf16.mxu1 %v1180_v18 }
  0x3c   :  { %915 = vmatmul.mubr.msk.f32.gmra.mrb[2].mxu1 %vm103_vm0, %v33_v54  ;;  %999 = vmatpush1.bf16.msra.mxu0 %v1183_v22  ;;  %v426_v18 = vshrl.u32 %v425_v17, 7 }
  0x3d   :  { %1015 = vmatpush1.bf16.msra.mxu1 %v1187_v26  ;;  %1001 = vmatprep.subr.bf16.mxu0 %v1189_v27  ;;  %v30_v26 = vld [vmem:[%s1357_s2] sm:$0xf]  ;;  %s891_s2 = sshll.u32 %s1129_s0, 4  ;;  %s892_s2 = int_to_ptr.vmem [resolvable:$true] %s891_s2 }
  0x3e   :  { %1017 = vmatprep.subr.bf16.mxu1 %v1191_v31  ;;  %611 = vmatprep.mubr.f32.mxu0 %v1128_v0  ;;  %v427_v22 = vsub.s32 0, %v426_v18  ;;  %v435_v27 = vsub.s32 2, %v426_v18  ;;  %v431_v31 = vsub.s32 1, %v426_v18  ;;  %s1099_s16 = scalar_lea.vmem %s892_s2, 2048  ;;  %p1104_p9 = scmp.lt.s32.totalorder %s892_s2, %s892_s2 }
  0x3f   :  { %688 = vmatprep.mubr.f32.mxu1 %v1128_v0  ;;  %p1100_p8 = scmp.ne.s32.totalorder %s892_s2, %s1099_s16  ;;  %p1105_p10 = scmp.lt.s32.totalorder %s1099_s16, %s1099_s16 }
  0x40   :  { %1003 = vmatpush1.bf16.msra.mxu0 %v1194_v35  ;;  %v439_v35 = vsub.s32 3, %v426_v18 }
  0x41   :  { %1019 = vmatpush1.bf16.msra.mxu1 %v1198_v39  ;;  %1005 = vmatprep.subr.bf16.mxu0 %v1200_v40  ;;  %v428_v39 = vrot.slane %v30_v26, %v427_v22  ;;  %v436_v40 = vrot.slane %v30_v26, %v435_v27  ;;  %p1106_p11 = por %p1105_p10, %p1104_p9 }
  0x42   :  { %1021 = vmatprep.subr.bf16.mxu1 %v1203_v44  ;;  %v432_v44 = vrot.slane %v30_v26, %v431_v31 }
  0x43   :  { %p1107_p12 = pnand %p1106_p11, %p1100_p8 }
  0x44   :  { %1007 = vmatpush1.bf16.msra.mxu0 %v1206_v51  ;;  %v440_v51 = vrot.slane %v30_v26, %v439_v35 }
  0x45   :  { %1023 = vmatpush1.bf16.msra.mxu1 %v1210_v52  ;;  %1025 = vmatprep.subr.bf16.mxu0 %v1212_v53 }
  0x46   :  { %1041 = vmatprep.subr.bf16.mxu1 %v1215_v57 }
  0x47   :  { %920 = vmatmul.mubr.msk.f32.vlgmr.msra.gmra.mrb[4].mxu0 %vm103_vm0, %v918_v4 }
  0x48   :  { %922 = vmatmul.mubr.msk.f32.vlgmr.msra.gmra.mrb[4].mxu1 %vm103_vm0, %v918_v4  ;;  %1027 = vmatpush1.bf16.msra.mxu0 %v1221_v1 }
  0x49   :  { %1043 = vmatpush1.bf16.msra.mxu1 %v1225_v2  ;;  %1029 = vmatprep.subr.bf16.mxu0 %v1227_v3 }
  0x4a   :  { %1045 = vmatprep.subr.bf16.mxu1 %v1230_v10  ;;  %617 = vmatprep.mubr.f32.mxu0 %v1128_v0 }
  0x4b   :  { %694 = vmatprep.mubr.f32.mxu1 %v1128_v0  ;;  %921 = vmatmul.mubr.msk.f32.gmra.mrb[6].mxu0 %vm103_vm0, %v919_v8 }
  0x4c   :  { %1031 = vmatpush1.bf16.msra.mxu0 %v1235_v19  ;;  %923 = vmatmul.mubr.msk.f32.gmra.mrb[6].mxu1 %vm103_vm0, %v919_v8 }
  0x4d   :  { %1047 = vmatpush1.bf16.msra.mxu1 %v1242_v21  ;;  %1033 = vmatprep.subr.bf16.mxu0 %v1244_v23 }
  0x4e   :  { %1049 = vmatprep.subr.bf16.mxu1 %v1247_v29  ;;  %771 = vmatprep.mubr.f32.mxu0 %v1128_v0 }
  0x4f   :  { %848 = vmatprep.mubr.f32.mxu1 %v1128_v0 }
  0x50   :  { %1035 = vmatpush1.bf16.msra.mxu0 %v1253_v37 }
  0x51   :  { %1051 = vmatpush1.bf16.msra.mxu1 %v1258_v38  ;;  %1037 = vmatprep.subr.bf16.mxu0 %v1260_v41 }
  0x52   :  { %1053 = vmatprep.subr.bf16.mxu1 %v988_v45 }
  0x54   :  { %1039 = vmatpush1.bf16.msra.mxu0 %v974_v48 }
  0x55   :  { %1055 = vmatpush1.bf16.msra.mxu1 %v990_v49 }
  0x57   :  { %924 = vmatmul.mubr.msk.f32.vlgmr.msra.gmra.mrb[4].mxu0 %vm103_vm0, %v916_v9 }
  0x58   :  { %926 = vmatmul.mubr.msk.f32.vlgmr.msra.gmra.mrb[4].mxu1 %vm103_vm0, %v916_v9  ;;  %777 = vmatprep.mubr.f32.mxu0 %v1128_v0 }
  0x59   :  { %854 = vmatprep.mubr.f32.mxu1 %v1128_v0 }
  0x5b   :  { %925 = vmatmul.mubr.msk.f32.gmra.mrb[6].mxu0 %vm103_vm0, %v917_v13 }
  0x5c   :  { %927 = vmatmul.mubr.msk.f32.gmra.mrb[6].mxu1 %vm103_vm0, %v917_v13 }
 0x10a   :  { %v336_v52 = vpop.f32.mrb[0].mxu0 }
 0x10b   :  { %v445_v0 = vadd.f32 %v428_v39, %v336_v52  ;;  %v413_v53 = vpop.f32.mrb[0].mxu1  ;;  %v338_v55 = vpop.f32.mrb[1].mxu0 }
 0x10c   :  { %v447_v56 = vadd.f32 %v436_v40, %v413_v53  ;;  %v446_v57 = vadd.f32 %v432_v44, %v338_v55  ;;  %v415_v58 = vpop.f32.mrb[1].mxu1 }
 0x10d   :  { %v453_v59 = vmax.f32 %v445_v0, 0.0  ;;  %v448_v60 = vadd.f32 %v440_v51, %v415_v58 }
 0x10e   :  { %v455_v61 = vmax.f32 %v447_v56, 0.0  ;;  %v454_v62 = vmax.f32 %v446_v57, 0.0  ;;  %v342_v63 = vpop.f32.mrb[2].mxu0 }
 0x10f   :  { %461 = vst [vmem:[#allocation5] sm:$0xff] %v453_v59  ;;  %v456_v1 = vmax.f32 %v448_v60, 0.0  ;;  %v449_v2 = vadd.f32 %v428_v39, %v342_v63  ;;  %v419_v3 = vpop.f32.mrb[2].mxu1  ;;  %v344_v5 = vpop.f32.mrb[3].mxu0 }
 0x110   :  { %463 = vst [vmem:[#allocation5 + $0x10] sm:$0xff] %v455_v61  ;;  %462 = vst [vmem:[#allocation5 + $0x8] sm:$0xff] %v454_v62  ;;  %v451_v6 = vadd.f32 %v436_v40, %v419_v3  ;;  %v450_v7 = vadd.f32 %v432_v44, %v344_v5  ;;  %v421_v10 = vpop.f32.mrb[3].mxu1 }
 0x111   :  { %464 = vst [vmem:[#allocation5 + $0x18] sm:$0xff] %v456_v1  ;;  %v457_v11 = vmax.f32 %v449_v2, 0.0  ;;  %v452_v12 = vadd.f32 %v440_v51, %v421_v10 }
 0x112   :  { %v459_v14 = vmax.f32 %v451_v6, 0.0  ;;  %v458_v15 = vmax.f32 %v450_v7, 0.0 }
 0x113   :  { %465 = vst [vmem:[#allocation5 + $0x20] sm:$0xff] %v457_v11  ;;  %v460_v16 = vmax.f32 %v452_v12, 0.0 }
 0x114   :  { %467 = vst [vmem:[#allocation5 + $0x30] sm:$0xff] %v459_v14  ;;  %466 = vst [vmem:[#allocation5 + $0x28] sm:$0xff] %v458_v15 }
 0x115   :  { %468 = vst [vmem:[#allocation5 + $0x38] sm:$0xff] %v460_v16 }
 0x12a   :  { %v773_v19 = vpop.f32.mrb[4].mxu0 }
 0x12b   :  { %v861_v20 = vadd.f32 %v773_v19, %v428_v39  ;;  %v850_v21 = vpop.f32.mrb[4].mxu1  ;;  %v775_v23 = vpop.f32.mrb[5].mxu0 }
 0x12c   :  { %v863_v24 = vadd.f32 %v850_v21, %v436_v40  ;;  %v862_v25 = vadd.f32 %v775_v23, %v432_v44  ;;  %v852_v28 = vpop.f32.mrb[5].mxu1 }
 0x12d   :  { %v869_v29 = vmax.f32 %v861_v20, 0.0  ;;  %v864_v30 = vadd.f32 %v852_v28, %v440_v51 }
 0x12e   :  { %v871_v32 = vmax.f32 %v863_v24, 0.0  ;;  %v870_v33 = vmax.f32 %v862_v25, 0.0  ;;  %v779_v34 = vpop.f32.mrb[6].mxu0 }
 0x12f   :  { %878 = vst [vmem:[#allocation5 + $0x40] sm:$0xff] %v869_v29  ;;  %v872_v36 = vmax.f32 %v864_v30, 0.0  ;;  %v865_v37 = vadd.f32 %v779_v34, %v428_v39  ;;  %v856_v38 = vpop.f32.mrb[6].mxu1  ;;  %v781_v41 = vpop.f32.mrb[7].mxu0 }
 0x130   :  { %880 = vst [vmem:[#allocation5 + $0x50] sm:$0xff] %v871_v32  ;;  %879 = vst [vmem:[#allocation5 + $0x48] sm:$0xff] %v870_v33  ;;  %v867_v42 = vadd.f32 %v856_v38, %v436_v40  ;;  %v866_v43 = vadd.f32 %v781_v41, %v432_v44  ;;  %v858_v45 = vpop.f32.mrb[7].mxu1 }
 0x131   :  { %881 = vst [vmem:[#allocation5 + $0x58] sm:$0xff] %v872_v36  ;;  %v873_v46 = vmax.f32 %v865_v37, 0.0  ;;  %v868_v47 = vadd.f32 %v858_v45, %v440_v51 }
 0x132   :  { %v875_v48 = vmax.f32 %v867_v42, 0.0  ;;  %v874_v49 = vmax.f32 %v866_v43, 0.0 }
 0x133   :  { %882 = vst [vmem:[#allocation5 + $0x60] sm:$0xff] %v873_v46  ;;  %v876_v50 = vmax.f32 %v868_v47, 0.0 }
 0x134   :  { %884 = vst [vmem:[#allocation5 + $0x70] sm:$0xff] %v875_v48  ;;  %883 = vst [vmem:[#allocation5 + $0x68] sm:$0xff] %v874_v49 }
 0x135   :  { %885 = vst [vmem:[#allocation5 + $0x78] sm:$0xff] %v876_v50 }
 0x136   :  { %1110 = shalt.err (!%p1107_p12)
}
 0x137   :  { %s1111_s19 = scalar_lea.hbm %s1358_s3, 2048 }
 0x138   :  { %p1112_p13 = scmp.ne.s32.totalorder %s1358_s3, %s1111_s19  ;;  %p1115_p0 = scmp.lt.u32.totalorder %s1111_s19, %s1358_s3 }
 0x13a   :  { %p1117_p1 = pnand %p1115_p0, %p1112_p13 }
 0x13c   :  { %1120 = shalt.err (!%p1117_p1)
}
 0x13d   :  { %897 = dma.vmem_to_hbm [thread:$0]  %s892_s2, 2048, %s1358_s3, [#allocation4], %s1126_s22, %s1126_s22, %s1127_s23  }
 0x13e   :  { %1123 = dma.done.wait [#allocation4], 2048  }
 0x13f   :  { %1124 = vsyncadd [#allocation4], 4294965248 }
 0x140   :  { %901 = vsyncpa [#allocation3], 1 }
 0x141   :  { %902 = vsyncpa [#allocation4], 1 }

</bundles_post_ra>
